<compile_context>
chip_gen: v7x
topology: tpu7x:2x2x1
jax: 0.10.0
libtpu: 0.0.40
codegen_flags: <defaults>
</compile_context>

<pallas_src>
import jax
import jax.numpy as jnp
from jax.experimental import pallas as pl
from jax.experimental.pallas import tpu as pltpu


def _ds(start, size, stride):
    return pl.ds(start, size) if stride == 1 else pl.ds(start, size, stride=stride)


def soft_pooling_2d(x, kernel_size, strides=None, padding=0):
    """Pallas implementation of SoftPooling2D.forward for NCHW float inputs."""
    if strides is None:
        strides = kernel_size
    if padding != 0:
        # TODO(synk): padding > 0 path (zero-pads exp(x) and exp(x)*x before pooling).
        raise NotImplementedError("padding != 0 not implemented")

    k = int(kernel_size)
    s = int(strides)
    N, C, H, W = x.shape
    NC = N * C
    Ho = (H - k) // s + 1
    Wo = (W - k) // s + 1

    # ---- lane (N*C) tiling: keep channels on the lane axis; only tile it when
    # it is a clean multiple of 128 (otherwise use the full extent).
    if NC % 128 == 0:
        TNC = 128
        while TNC * 2 <= 512 and NC % (TNC * 2) == 0:
            TNC *= 2
    else:
        TNC = NC
    grid_nc = NC // TNC

    # ---- output-row tiling (batch many rows per step, bounded VMEM footprint).
    if k <= s:
        row_bytes = s * W * TNC * 4           # f32 input rows consumed per output row
        budget = 2 * 1024 * 1024              # keep per-step block ~2 MiB (fits v7x too)
        THo = max(1, min(Ho, budget // max(row_bytes, 1)))
        if Ho >= 2:                           # >=2 grid steps -> both v7x cores get work
            THo = min(THo, -(-Ho // 2))
        in_rows = THo * s
    else:
        # Overlapping windows (k > stride): input row blocks would overlap, so
        # process the full height in one step.
        # TODO(synk): row-tile the overlapping-window (k > stride) case.
        THo = Ho
        in_rows = H
    grid_rows = -(-Ho // THo)

    def kernel(x_ref, o_ref):
        acc_num = None
        acc_den = None
        # k*k unrolled strided-window loads + adds: pure VPU/EUP work, no MXU.
        for a in range(k):
            for b in range(k):
                xv = x_ref[_ds(a, THo, s), _ds(b, Wo, s), :].astype(jnp.float32)
                ev = jnp.exp(xv)
                nv = ev * xv
                acc_den = ev if acc_den is None else acc_den + ev
                acc_num = nv if acc_num is None else acc_num + nv
        # avgpool's 1/k^2 factor cancels in the ratio; reciprocal uses the EUP slot.
        o_ref[...] = (acc_num * pl.reciprocal(acc_den, approx=False)).astype(o_ref.dtype)

    # (H, W, N*C): pooling axes are outer/sublane, channels sit lane-dense.
    x_t = jnp.transpose(x.reshape(NC, H, W), (1, 2, 0))

    out_t = pl.pallas_call(
        kernel,
        out_shape=jax.ShapeDtypeStruct((Ho, Wo, NC), x.dtype),
        grid=(grid_rows, grid_nc),
        in_specs=[pl.BlockSpec((in_rows, W, TNC), lambda i, j: (i, 0, j))],
        out_specs=pl.BlockSpec((THo, Wo, TNC), lambda i, j: (i, 0, j)),
        compiler_params=pltpu.CompilerParams(
            dimension_semantics=("parallel", "parallel")),
    )(x_t)

    return jnp.transpose(out_t, (2, 0, 1)).reshape(N, C, Ho, Wo)


def _reference_softpool(x, kernel_size, strides):
    """Pure-JAX reference mirroring torch AvgPool2d(padding=0)."""
    def avgpool(v):
        ssum = jax.lax.reduce_window(
            v, 0.0, jax.lax.add,
            (1, 1, kernel_size, kernel_size),
            (1, 1, strides, strides), "VALID")
        return ssum / float(kernel_size * kernel_size)
    ex = jnp.exp(x)
    return avgpool(ex * x) / avgpool(ex)


if __name__ == "__main__":
    key = jax.random.PRNGKey(0)
    N, C, H, W = 2, 4, 16, 16
    kernel_size = 2
    strides = 2

    x = jax.random.normal(key, (N, C, H, W), dtype=jnp.float32)

    out = soft_pooling_2d(x, kernel_size=kernel_size, strides=strides)
    out = jax.block_until_ready(out)

    ref = _reference_softpool(x, kernel_size, strides)
    assert out.shape == (N, C, H // strides, W // strides)
    assert jnp.allclose(out, ref, atol=1e-5, rtol=1e-5)

    print("KERNEL_OK")
</pallas_src>

<mosaic_0001>
module attributes {stable_mosaic.version = 11 : i64} {
  func.func @kernel(%arg0: i32, %arg1: i32, %arg2: memref<8x16x8xf32, #tpu.memory_space<vmem>>, %arg3: memref<4x8x8xf32, #tpu.memory_space<vmem>>) attributes {dimension_semantics = [#tpu.dimension_semantics<parallel>, #tpu.dimension_semantics<parallel>], iteration_bounds = array<i64: 2, 1>, scalar_prefetch = 0 : i64, scratch_operands = 0 : i64, tpu.core_type = #tpu.core_type<tc>, window_params = [{transform_indices = @transform_0, window_bounds = array<i64: 8, 16, 8>}, {transform_indices = @transform_1, window_bounds = array<i64: 4, 8, 8>}]} {
    %c0 = arith.constant 0 : index
    %c0_0 = arith.constant 0 : index
    %c0_1 = arith.constant 0 : index
    %0 = tpu.strided_load %arg2[%c0, %c0_0, %c0_1] {strides = array<i32: 2, 2, 1>} : memref<8x16x8xf32, #tpu.memory_space<vmem>>, vector<4x8x8xf32>
    %1 = math.exp %0 : vector<4x8x8xf32>
    %2 = arith.mulf %1, %0 : vector<4x8x8xf32>
    %c0_2 = arith.constant 0 : index
    %c1 = arith.constant 1 : index
    %c0_3 = arith.constant 0 : index
    %3 = tpu.strided_load %arg2[%c0_2, %c1, %c0_3] {strides = array<i32: 2, 2, 1>} : memref<8x16x8xf32, #tpu.memory_space<vmem>>, vector<4x8x8xf32>
    %4 = math.exp %3 : vector<4x8x8xf32>
    %5 = arith.mulf %4, %3 : vector<4x8x8xf32>
    %6 = arith.addf %1, %4 : vector<4x8x8xf32>
    %7 = arith.addf %2, %5 : vector<4x8x8xf32>
    %c1_4 = arith.constant 1 : index
    %c0_5 = arith.constant 0 : index
    %c0_6 = arith.constant 0 : index
    %8 = tpu.strided_load %arg2[%c1_4, %c0_5, %c0_6] {strides = array<i32: 2, 2, 1>} : memref<8x16x8xf32, #tpu.memory_space<vmem>>, vector<4x8x8xf32>
    %9 = math.exp %8 : vector<4x8x8xf32>
    %10 = arith.mulf %9, %8 : vector<4x8x8xf32>
    %11 = arith.addf %6, %9 : vector<4x8x8xf32>
    %12 = arith.addf %7, %10 : vector<4x8x8xf32>
    %c1_7 = arith.constant 1 : index
    %c1_8 = arith.constant 1 : index
    %c0_9 = arith.constant 0 : index
    %13 = tpu.strided_load %arg2[%c1_7, %c1_8, %c0_9] {strides = array<i32: 2, 2, 1>} : memref<8x16x8xf32, #tpu.memory_space<vmem>>, vector<4x8x8xf32>
    %14 = math.exp %13 : vector<4x8x8xf32>
    %15 = arith.mulf %14, %13 : vector<4x8x8xf32>
    %16 = arith.addf %11, %14 : vector<4x8x8xf32>
    %17 = arith.addf %12, %15 : vector<4x8x8xf32>
    %18 = tpu.reciprocal %16 : vector<4x8x8xf32> -> vector<4x8x8xf32>
    %19 = arith.mulf %17, %18 : vector<4x8x8xf32>
    %c0_10 = arith.constant 0 : index
    %c0_11 = arith.constant 0 : index
    %c0_12 = arith.constant 0 : index
    %20 = vector.load %arg3[%c0_10, %c0_11, %c0_12] : memref<4x8x8xf32, #tpu.memory_space<vmem>>, vector<4x8x8xf32>
    tpu.vector_store %arg3[%c0_10, %c0_11, %c0_12], %19 {strides = array<i32>} : memref<4x8x8xf32, #tpu.memory_space<vmem>>, vector<4x8x8xf32>,
    return
  }
  func.func @transform_0(%arg0: i32, %arg1: i32) -> (i32, i32, i32) {
    %c0_i32 = arith.constant 0 : i32
    %c0_i32_0 = arith.constant 0 : i32
    return %arg0, %c0_i32, %arg1 : i32, i32, i32
  }
  func.func @transform_1(%arg0: i32, %arg1: i32) -> (i32, i32, i32) {
    %c0_i32 = arith.constant 0 : i32
    %c0_i32_0 = arith.constant 0 : i32
    return %arg0, %c0_i32, %arg1 : i32, i32, i32
  }
}

</mosaic_0001>

<bundles_post_ra>
// kernel: tpu_custom_call.1
= control target key start
LH: loop header
LB: loop body
LE: loop exit
PB: predicated region body
PF: predicated region fallthrough
CT: control target
= control target key end

     0   :  { %6 = vsyncpa [#allocation3], 0  ;;  %s755_s0 = inlined_call_operand.vmem [shape: f32[16,16,8], index: 0, kind: input, shape index: {}]   ;;  %s756_s1 = inlined_call_operand.hbm [shape: f32[8,8,8], index: 1, kind: output, shape index: {}]  }
   0x1   :  { %8 = vsyncpa [#allocation3 + $0x1], 0  ;;  %s583_s6 = smov 0   ;;  %s585_s7 = smov 0  }
   0x2   :  { %s587_s8 = smov 0   ;;  %s589_s9 = smov 0  }
   0x3   :  { %s591_s10 = smov 0   ;;  %s593_s11 = smov 0  }
   0x4 LB: > { %s362_s12 = sadd.s32 4294967295, %s568_s11   ;;  %s363_s13 = sadd.s32 4294967294, %s568_s11   ;;  %s568_s11 = sphi %s593_s11, %s14_s11   ;;  %s564_s10 = sphi %s591_s10, %s763_s10   ;;  %s560_s9 = sphi %s589_s9, %s762_s9   ;;  %s556_s8 = sphi %s587_s8, %s761_s8   ;;  %s552_s7 = sphi %s585_s7, %s760_s7   ;;  %s548_s6 = sphi %s583_s6, %s759_s6  }
   0x5   : > { %s26_s14 = sadd.s32 1, %s564_s10  ;;  %s63_s15 = sadd.s32 1, %s556_s8 }
   0x6   : > { %p28_p0 = scmp.ge.s32.totalorder %s26_s14, 2  ;;  %p73_p1 = scmp.ne.s32.totalorder %s556_s8, %s552_s7 }
   0x7   : > { %p74_p2 = scmp.eq.s32.totalorder %s362_s12, 1  ;;  %p79_p3 = scmp.ne.s32.totalorder %s552_s7, %s548_s6 }
   0x8   : > { %s765_s14 = smov (%p28_p0, %s26_s14), 0  ;;  %p80_p5 = scmp.eq.s32.totalorder %s363_s13, 1 }
   0x9   : > { %p623_p4 = por %p74_p2, %p73_p1  ;;  %s58_s17 = ssub.s32 %s564_s10, %s765_s14 }
   0xa   : > { %p366_p6 = scmp.ge.s32.totalorder %s568_s11, 1  ;;  %p61_p7 = scmp.eq.s32.totalorder %s58_s17, 0 }
   0xb   : > { %p630_p8 = por %p80_p5, %p79_p3  ;;  %p111_p9 = scmp.lt.s32.totalorder %s568_s11, 3 }
   0xc   : > { %s636_s19 = scalar_select %p61_p7, %s556_s8, %s63_s15  }
   0xd   : > { %p112_p10 = pnand %p366_p6, %p111_p9 }
   0xe   : > { %s368_s20 = sshll.u32 (!%p112_p10), %s560_s9, 3  ;;  %s132_s25 = sand.u32 (!%p112_p10), 1, %s552_s7   ;;  %vm257_vm0 = vcmask (!%p112_p10), 64512  }
   0xf   : > { %115 = sbr.rel (%p112_p10) target bundleno = 86 (0x56), region = 24  ;;  %p136_p11 = scmp.lt.s32.totalorder (!%p112_p10), %s368_s20, 15 }
  0x10   : > { %s367_s26 = sshll.u32 (!%p112_p10), %s132_s25, 5  ;;  %s392_s29 = sshll.u32 (!%p112_p10), %s560_s9, 9 }
  0x11   : > { %s134_s27 = scalar_lea.vmem (!%p112_p10), [#allocation2], %s367_s26  ;;  %s704_s3 = scalar_lea.hbm (!%p112_p10), %s756_s1, %s392_s29 }
  0x12   : > { %s277_s28 = sshll.u32 (!%p112_p10), %s134_s27, 4  ;;  %s709_s4 = scalar_lea.sflag (!%p112_p10), [#allocation3], %s132_s25  ;;  %s699_s28 = int_to_ptr.vmem [resolvable:$true] %s277_s28 }
  0x13   : > { %s490_s5 = scalar_lea.vmem (!%p112_p10), %s699_s28, 512  ;;  %s570_s9 = smov (!%p112_p10), [#allocation2]  }
  0x14   : > { %p491_p12 = scmp.ne.s32.totalorder (!%p112_p10), %s699_s28, %s490_s5  ;;  %s494_s12 = sshll.u32 (!%p112_p10), %s570_s9, 4  ;;  %s495_s12 = int_to_ptr.vmem [resolvable:$false] %s494_s12 }
  0x15   : > { %s496_s13 = scalar_lea.vmem (!%p112_p10), %s495_s12, 1024  ;;  %p497_p1 = scmp.lt.s32.totalorder (!%p112_p10), %s699_s28, %s495_s12 }
  0x16   : > { %s767_s20 = smov (!%p136_p11, %s368_s20), 15  ;;  %p492_p13 = pnand %p491_p12, %p623_p4 }
  0x17   : > { %s391_s21 = sshll.u32 %s767_s20, 4  ;;  %p498_p2 = scmp.lt.s32.totalorder %s496_s13, %s490_s5 }
  0x18   : > { %s642_s24 = scalar_lea.vmem %s755_s0, %s391_s21  ;;  %p493_p0 = pneg %p492_p13 }
  0x19   : > { %v146_v0 = vld [vmem:[%s642_s24] ss:$2 sm:$0xff]  ;;  %v374_v1 = vld [vmem:[%s642_s24 + $0x1] ss:$2 sm:$0xff]  ;;  %v378_v2 = vld [vmem:[%s642_s24 + $0x10] ss:$2 sm:$0xff]  ;;  %p499_p3 = por %p498_p2, %p497_p1 }
  0x1a   : > { %v153_v3 = vmul.f32 1.442695, %v146_v0  ;;  %v173_v4 = vmul.f32 1.442695, %v374_v1  ;;  %v201_v5 = vmul.f32 1.442695, %v378_v2 }
  0x1b   : > { %v648_v6 = vld [vmem:[%s642_s24 + $0x11] ss:$2 sm:$0xff]  ;;  %v371_v7 = vld [vmem:[%s642_s24 + $0x20] ss:$2 sm:$0xff]  ;;  %v375_v8 = vld [vmem:[%s642_s24 + $0x21] ss:$2 sm:$0xff]  ;;  %p500_p5 = pnand %p499_p3, %p493_p0 }
  0x1c   : > { %450 = vpow2.f32 %v153_v3  ;;  %v229_v9 = vmul.f32 1.442695, %v648_v6  ;;  %v155_v10 = vmul.f32 1.442695, %v371_v7  ;;  %v175_v11 = vmul.f32 1.442695, %v375_v8 }
  0x1d   : > { %452 = vpow2.f32 %v173_v4  ;;  %v379_v12 = vld [vmem:[%s642_s24 + $0x30] ss:$2 sm:$0xff]  ;;  %v655_v13 = vld [vmem:[%s642_s24 + $0x31] ss:$2 sm:$0xff]  ;;  %v372_v14 = vld [vmem:[%s642_s24 + $0x40] ss:$2 sm:$0xff] }
  0x1e   : > { %454 = vpow2.f32 %v201_v5  ;;  %v203_v15 = vmul.f32 1.442695, %v379_v12  ;;  %v231_v16 = vmul.f32 1.442695, %v655_v13  ;;  %v376_v17 = vld [vmem:[%s642_s24 + $0x41] ss:$2 sm:$0xff] }
  0x1f   : > { %456 = vpow2.f32 %v229_v9  ;;  %v661_v18 = vld [vmem:[%s642_s24 + $0x50] ss:$2 sm:$0xff]  ;;  %v157_v19 = vmul.f32 1.442695, %v372_v14  ;;  %v664_v20 = vld [vmem:[%s642_s24 + $0x51] ss:$2 sm:$0xff] }
  0x20   : > { %458 = vpow2.f32 %v155_v10  ;;  %v177_v21 = vmul.f32 1.442695, %v376_v17  ;;  %v667_v22 = vld [vmem:[%s642_s24 + $0x60] ss:$2 sm:$0xff]  ;;  %v205_v23 = vmul.f32 1.442695, %v661_v18 }
  0x21   : > { %460 = vpow2.f32 %v175_v11  ;;  %v671_v24 = vld [vmem:[%s642_s24 + $0x61] ss:$2 sm:$0xff]  ;;  %v233_v25 = vmul.f32 1.442695, %v664_v20  ;;  %v675_v26 = vld [vmem:[%s642_s24 + $0x70] ss:$2 sm:$0xff] }
  0x22   : > { %462 = vpow2.f32 %v203_v15  ;;  %v159_v27 = vmul.f32 1.442695, %v667_v22  ;;  %v679_v28 = vld [vmem:[%s642_s24 + $0x71] ss:$2 sm:$0xff]  ;;  %v179_v29 = vmul.f32 1.442695, %v671_v24 }
  0x23   : > { %464 = vpow2.f32 %v231_v16  ;;  %v207_v31 = vmul.f32 1.442695, %v675_v26  ;;  %v235_v34 = vmul.f32 1.442695, %v679_v28 }
  0x24   : > { %466 = vpow2.f32 %v157_v19 }
  0x25   : > { %468 = vpow2.f32 %v177_v21 }
  0x26   : > { %v451_v30 = vpop.eup %450  ;;  %470 = vpow2.f32 %v205_v23 }
  0x27   : > { %v453_v32 = vpop.eup %452  ;;  %v161_v33 = vmul.f32 %v451_v30, %v146_v0  ;;  %472 = vpow2.f32 %v233_v25 }
  0x28   : > { %v455_v35 = vpop.eup %454  ;;  %v181_v36 = vmul.f32 %v453_v32, %v374_v1  ;;  %v185_v37 = vadd.f32 %v453_v32, %v451_v30  ;;  %474 = vpow2.f32 %v159_v27 }
  0x29   : > { %v457_v38 = vpop.eup %456  ;;  %476 = vpow2.f32 %v179_v29  ;;  %v209_v43 = vmul.f32 %v455_v35, %v378_v2 }
  0x2a   : > { %v459_v39 = vpop.eup %458  ;;  %v213_v40 = vadd.f32 %v455_v35, %v185_v37  ;;  %478 = vpow2.f32 %v207_v31  ;;  %v189_v42 = vadd.f32 %v181_v36, %v161_v33  ;;  %v237_v54 = vmul.f32 %v457_v38, %v648_v6 }
  0x2b   : > { %v461_v41 = vpop.eup %460  ;;  %480 = vpow2.f32 %v235_v34  ;;  %v162_v46 = vmul.f32 %v459_v39, %v371_v7 }
  0x2c   : > { %v463_v44 = vpop.eup %462  ;;  %v241_v45 = vadd.f32 %v457_v38, %v213_v40  ;;  %v182_v47 = vmul.f32 %v461_v41, %v375_v8  ;;  %v186_v48 = vadd.f32 %v461_v41, %v459_v39  ;;  %v217_v53 = vadd.f32 %v209_v43, %v189_v42 }
  0x2d   : > { %v465_v49 = vpop.eup %464  ;;  %v210_v57 = vmul.f32 %v463_v44, %v379_v12 }
  0x2e   : > { %v467_v50 = vpop.eup %466  ;;  %482 = vrcp.f32 %v241_v45  ;;  %v214_v51 = vadd.f32 %v463_v44, %v186_v48  ;;  %v190_v56 = vadd.f32 %v182_v47, %v162_v46  ;;  %v245_v2 = vadd.f32 %v237_v54, %v217_v53 }
  0x2f   : > { %v469_v52 = vpop.eup %468  ;;  %v163_v61 = vmul.f32 %v467_v50, %v372_v14  ;;  %v238_v5 = vmul.f32 %v465_v49, %v655_v13 }
  0x30   : > { %v471_v55 = vpop.eup %470  ;;  %v242_v58 = vadd.f32 %v465_v49, %v214_v51  ;;  %v187_v59 = vadd.f32 %v469_v52, %v467_v50  ;;  %v183_v62 = vmul.f32 %v469_v52, %v376_v17  ;;  %v218_v4 = vadd.f32 %v210_v57, %v190_v56 }
  0x31   : > { %v473_v60 = vpop.eup %472  ;;  %v211_v10 = vmul.f32 %v471_v55, %v661_v18 }
  0x32   : > { %v475_v63 = vpop.eup %474  ;;  %484 = vrcp.f32 %v242_v58  ;;  %v215_v0 = vadd.f32 %v471_v55, %v187_v59  ;;  %v191_v9 = vadd.f32 %v183_v62, %v163_v61  ;;  %v246_v16 = vadd.f32 %v238_v5, %v218_v4 }
  0x33   : > { %v477_v1 = vpop.eup %476  ;;  %v164_v11 = vmul.f32 %v475_v63, %v667_v22  ;;  %v239_v17 = vmul.f32 %v473_v60, %v664_v20 }
  0x34   : > { %v479_v3 = vpop.eup %478  ;;  %v243_v6 = vadd.f32 %v473_v60, %v215_v0  ;;  %v188_v7 = vadd.f32 %v477_v1, %v475_v63  ;;  %v184_v12 = vmul.f32 %v477_v1, %v671_v24  ;;  %v219_v21 = vadd.f32 %v211_v10, %v191_v9 }
  0x35   : > { %v481_v8 = vpop.eup %480  ;;  %v212_v25 = vmul.f32 %v479_v3, %v675_v26 }
  0x36   : > { %486 = vrcp.f32 %v243_v6  ;;  %v216_v14 = vadd.f32 %v479_v3, %v188_v7  ;;  %v192_v23 = vadd.f32 %v184_v12, %v164_v11  ;;  %v247_v24 = vadd.f32 %v239_v17, %v219_v21 }
  0x37   : > { %v240_v29 = vmul.f32 %v481_v8, %v679_v28 }
  0x38   : > { %v483_v15 = vpop.eup %482  ;;  %v244_v13 = vadd.f32 %v481_v8, %v216_v14  ;;  %v220_v27 = vadd.f32 %v212_v25, %v192_v23 }
  0x39   : > { %v253_v19 = vmul.f32 %v483_v15, %v245_v2 }
  0x3a   : > { %488 = vrcp.f32 %v244_v13  ;;  %v248_v31 = vadd.f32 %v240_v29, %v220_v27 }
  0x3b   : > { %258 = vst.msk [vmem:[%s134_s27] sm:$0xff] %vm257_vm0, %v253_v19 }
  0x3c   : > { %v485_v18 = vpop.eup %484 }
  0x3d   : > { %v254_v22 = vmul.f32 %v485_v18, %v246_v16 }
  0x3f   : > { %259 = vst.msk [vmem:[%s134_s27 + $0x8] sm:$0xff] %vm257_vm0, %v254_v22 }
  0x40   : > { %v487_v20 = vpop.eup %486 }
  0x41   : > { %v255_v30 = vmul.f32 %v487_v20, %v247_v24 }
  0x43   : > { %260 = vst.msk [vmem:[%s134_s27 + $0x10] sm:$0xff] %vm257_vm0, %v255_v30 }
  0x44   : > { %v489_v26 = vpop.eup %488 }
  0x45   : > { %v256_v28 = vmul.f32 %v489_v26, %v248_v31 }
  0x47   : > { %261 = vst.msk [vmem:[%s134_s27 + $0x18] sm:$0xff] %vm257_vm0, %v256_v28 }
  0x48   : > { %503 = shalt.err (!%p500_p5)
}
  0x49   : > { %s504_s15 = scalar_lea.hbm %s704_s3, 512  ;;  %s508_s21 = scalar_lea.hbm %s756_s1, 1024 }
  0x4a   : > { %p505_p6 = scmp.ne.s32.totalorder %s704_s3, %s504_s15  ;;  %p509_p10 = scmp.lt.u32.totalorder %s704_s3, %s756_s1 }
  0x4b   : > { %p510_p11 = scmp.lt.u32.totalorder %s508_s21, %s504_s15  ;;  %p512_p13 = scmp.lt.u32.totalorder %s504_s15, %s704_s3 }
  0x4c   : > { %p506_p7 = pnand %p505_p6, %p623_p4 }
  0x4d   : > { %p511_p12 = por %p510_p11, %p509_p10 }
  0x4e   : > { %p507_p9 = pneg %p506_p7 }
  0x4f   : > { %p513_p0 = por %p512_p13, %p511_p12 }
  0x51   : > { %p514_p1 = pnand %p513_p0, %p507_p9 }
  0x53   : > { %517 = shalt.err (!%p514_p1)
}
  0x54   : > { %s571_s24 = smov 128   ;;  %s572_s25 = smov 8  }
  0x55   : > { %393 = dma.vmem_to_hbm [thread:$0]  (%p623_p4), %s699_s28, 512, %s704_s3, %s709_s4, %s571_s24, %s571_s24, %s572_s25  }
  0x56 PF: > { %p399_p2 = scmp.ge.s32.totalorder %s568_s11, 2  ;;  %s292_s26 = sand.u32 1, %s548_s6  }
  0x57   : > { %s293_s27 = scalar_lea.sflag [#allocation3], %s292_s26 }
  0x58   : > { %p396_p3 = pnand %p399_p2, %p630_p8 }
  0x5a   : > { %543 = dma.done.wait (!%p396_p3), %s293_s27, 512  }
  0x5b   : > { %545 = vsyncadd (!%p396_p3), %s293_s27, 4294966784  ;;  %s14_s11 = sadd.s32 1, %s568_s11   ;;  %s759_s6 = smov %s552_s7 }
  0x5c   : > { %p11_p5 = scmp.ge.s32.totalorder %s14_s11, 4   ;;  %s760_s7 = smov %s556_s8 }
  0x5d   : > { %s761_s8 = smov %s636_s19  ;;  %s762_s9 = smov %s564_s10 }
  0x5e   : > { %s763_s10 = smov %s765_s14  ;;  %13 = sbr.rel (!%p11_p5) target bundleno = 4 (0x4), region = 74 }
  0x65   :  { %298 = vsyncpa [#allocation3], 1 }
  0x66   :  { %300 = vsyncpa [#allocation3 + $0x1], 1 }

</bundles_post_ra>
